<compile_context>
chip_gen: v7x
topology: tpu7x:2x2x1
jax: 0.10.0
libtpu: 0.0.40
codegen_flags: <defaults>
</compile_context>

<pallas_src>
import functools

import jax
import jax.numpy as jnp
from jax.experimental import pallas as pl
from jax.experimental.pallas import tpu as pltpu


def _round_up(x: int, m: int) -> int:
    return ((x + m - 1) // m) * m


def _mlp_policy_kernel(obs_ref, w1_ref, b1_ref, w2_ref, b2_ref, act_ref):
    """Fused 2-layer MLP policy forward: act = tanh(obs@W1 + b1) @ W2 + b2.

    obs arrives as f32 and is cast to bf16 in-kernel; both matmuls run on the
    MXU with f32 accumulation; the hidden activation stays in vregs; the
    output store is the unpadded (tb, act_dim) block.
    """
    obs_bf = obs_ref[...].astype(jnp.bfloat16)          # in-kernel cast (free)
    h = jnp.dot(obs_bf, w1_ref[...], preferred_element_type=jnp.float32)
    h = jnp.tanh(h + b1_ref[...])                       # bias broadcast (1, Hp)
    a = jnp.dot(h.astype(jnp.bfloat16), w2_ref[...],
                preferred_element_type=jnp.float32)
    act_ref[...] = a + b2_ref[...]                      # bias broadcast (1, A)


@functools.partial(jax.jit, static_argnames=("tile_b",))
def mlp_policy_forward(obs, w1, b1, w2, b2, *, tile_b: int = 2048):
    """Run the fused Pallas policy kernel.

    obs: (B, obs_dim) float32
    w1:  (obs_dim, H_pad) bf16, b1: (1, H_pad) f32
    w2:  (H_pad, act_dim) bf16, b2: (1, act_dim) f32
    returns actions: (B, act_dim) float32 (slice folded into this jit).
    """
    B, obs_dim = obs.shape
    h_pad = w1.shape[1]
    act_dim = w2.shape[1]

    # Tile selection:
    #  * large tiles amortize the ~0.35 us per-grid-step overhead
    #  * tb is a multiple of 16 (bf16 sublane packing of the obs tile)
    #  * balanced tiles cap batch-padding waste at one sublane group
    #  * >=2 grid steps (when B allows) so v7x megacore uses both TensorCores
    n_tiles = max(pl.cdiv(B, tile_b), 2 if B > 16 else 1)
    tb = _round_up(pl.cdiv(B, n_tiles), 16)
    b_padded = n_tiles * tb

    if b_padded != B:
        obs = jnp.pad(obs, ((0, b_padded - B), (0, 0)))

    act_padded = pl.pallas_call(
        _mlp_policy_kernel,
        out_shape=jax.ShapeDtypeStruct((b_padded, act_dim), jnp.float32),
        grid=(n_tiles,),
        in_specs=[
            pl.BlockSpec((tb, obs_dim), lambda i: (i, 0)),     # obs tile (f32)
            pl.BlockSpec((obs_dim, h_pad), lambda i: (0, 0)),  # W1 resident
            pl.BlockSpec((1, h_pad), lambda i: (0, 0)),        # b1 resident
            pl.BlockSpec((h_pad, act_dim), lambda i: (0, 0)),  # W2 resident
            pl.BlockSpec((1, act_dim), lambda i: (0, 0)),      # b2 resident
        ],
        out_specs=pl.BlockSpec((tb, act_dim), lambda i: (i, 0)),
        compiler_params=pltpu.CompilerParams(
            dimension_semantics=("parallel",)),
    )(obs, w1, b1, w2, b2)

    # Slice padded batch rows off INSIDE the jit (no extra dispatch).
    return act_padded[:B]


@jax.jit
def _single_obs_forward(obs, w1, b1, w2, b2):
    """Plain-JAX path for the per-step (single observation) rollout call; a
    1-row Pallas launch would be pure launch/pipeline-prologue overhead."""
    h = jnp.tanh(jnp.dot(obs.astype(jnp.bfloat16), w1,
                         preferred_element_type=jnp.float32) + b1[0])
    return jnp.dot(h.astype(jnp.bfloat16), w2,
                   preferred_element_type=jnp.float32) + b2[0]


class PallasPolicy:
    """Minimal stand-in for Pyrado's Policy: non-recurrent MLP policy."""

    name = "pallas_mlp_policy"

    def __init__(self, obs_dim: int, act_dim: int, hidden: int, key,
                 tile_b: int = 2048):
        self.input_size = obs_dim     # == env_spec.obs_space.flat_dim
        self.output_size = act_dim    # == env_spec.act_space.flat_dim
        self.hidden = hidden
        self.tile_b = tile_b

        self._h_pad = _round_up(hidden, 128)   # lane-pad hidden dim only

        k1, k2 = jax.random.split(key)
        # Deterministic synthetic parameter init (nn.Linear-like scale).
        w1 = (jax.random.uniform(k1, (obs_dim, hidden), jnp.float32, -1.0, 1.0)
              / jnp.sqrt(obs_dim))
        w2 = (jax.random.uniform(k2, (hidden, act_dim), jnp.float32, -1.0, 1.0)
              / jnp.sqrt(hidden))

        # bf16 weights; padded hidden units see zero W1 columns and zero b1,
        # so tanh(0) = 0, and their (zeroed) W2 rows contribute nothing.
        self.w1 = (jnp.zeros((obs_dim, self._h_pad), jnp.bfloat16)
                   .at[:, :hidden].set(w1.astype(jnp.bfloat16)))
        self.b1 = jnp.zeros((1, self._h_pad), jnp.float32)
        self.w2 = (jnp.zeros((self._h_pad, act_dim), jnp.bfloat16)
                   .at[:hidden, :].set(w2.astype(jnp.bfloat16)))
        self.b2 = jnp.zeros((1, act_dim), jnp.float32)

    @property
    def device(self) -> str:
        return "tpu"

    @property
    def is_recurrent(self) -> bool:
        return False

    @property
    def num_param(self) -> int:
        # Count only the logical (unpadded) parameters, like Policy.num_param.
        return (self.input_size * self.hidden + self.hidden
                + self.hidden * self.output_size + self.output_size)

    def init_hidden(self, batch_size: int = None):
        raise AttributeError(
            "Only recurrent policies should use the init_hidden() method.")

    def reset(self):
        pass  # non-recurrent: nothing to do

    def forward(self, obs):
        # Accept a single flat observation (Policy(obs) in a rollout) or a batch.
        if obs.ndim == 1:
            # Per-step rollout call: bypass the Pallas kernel entirely.
            return _single_obs_forward(obs, self.w1, self.b1, self.w2, self.b2)
        return mlp_policy_forward(obs, self.w1, self.b1, self.w2, self.b2,
                                  tile_b=self.tile_b)

    __call__ = forward


if __name__ == "__main__":
    key = jax.random.PRNGKey(0)
    k_param, k_obs = jax.random.split(key)

    batch, obs_dim, hidden, act_dim = 256, 16, 32, 4
    policy = PallasPolicy(obs_dim, act_dim, hidden, k_param, tile_b=128)

    obs = jax.random.normal(k_obs, (batch, obs_dim), jnp.float32)

    act = jax.block_until_ready(policy(obs))
    assert act.shape == (batch, act_dim)
    assert act.dtype == jnp.float32

    # Reference in plain JAX using the SAME bf16 quantization as the kernel
    # (obs -> bf16, bf16 weights, f32 accumulate, h -> bf16 before 2nd matmul),
    # so only matmul accumulation / tanh implementation details differ.
    obs_q = obs.astype(jnp.bfloat16).astype(jnp.float32)
    w1f = policy.w1.astype(jnp.float32)
    w2f = policy.w2.astype(jnp.float32)
    h_ref = jnp.tanh(jnp.dot(obs_q, w1f, precision=jax.lax.Precision.HIGHEST)
                     + policy.b1)
    ref = (jnp.dot(h_ref.astype(jnp.bfloat16).astype(jnp.float32), w2f,
                   precision=jax.lax.Precision.HIGHEST) + policy.b2)
    assert jnp.allclose(act, ref, atol=5e-3, rtol=5e-3)

    # Single-observation (per-step rollout) path — plain jitted JAX, no kernel.
    act1 = jax.block_until_ready(policy(obs[0]))
    assert act1.shape == (act_dim,)
    assert jnp.allclose(act1, ref[0], atol=5e-3, rtol=5e-3)

    print("KERNEL_OK")
</pallas_src>

<mosaic_0001>
module attributes {stable_mosaic.version = 11 : i64} {
  func.func @_mlp_policy_kernel(%arg0: i32, %arg1: memref<128x16xf32, #tpu.memory_space<vmem>>, %arg2: memref<16x128xbf16, #tpu.memory_space<vmem>>, %arg3: memref<1x128xf32, #tpu.memory_space<vmem>>, %arg4: memref<128x4xbf16, #tpu.memory_space<vmem>>, %arg5: memref<1x4xf32, #tpu.memory_space<vmem>>, %arg6: memref<128x4xf32, #tpu.memory_space<vmem>>) attributes {dimension_semantics = [#tpu.dimension_semantics<parallel>], iteration_bounds = array<i64: 2>, scalar_prefetch = 0 : i64, scratch_operands = 0 : i64, tpu.core_type = #tpu.core_type<tc>, window_params = [{transform_indices = @transform_0, window_bounds = array<i64: 128, 16>}, {pipeline_mode = #tpu.pipeline_mode<synchronous>, transform_indices = @transform_1, window_bounds = array<i64: 16, 128>}, {pipeline_mode = #tpu.pipeline_mode<synchronous>, transform_indices = @transform_2, window_bounds = array<i64: 1, 128>}, {pipeline_mode = #tpu.pipeline_mode<synchronous>, transform_indices = @transform_3, window_bounds = array<i64: 128, 4>}, {pipeline_mode = #tpu.pipeline_mode<synchronous>, transform_indices = @transform_4, window_bounds = array<i64: 1, 4>}, {transform_indices = @transform_5, window_bounds = array<i64: 128, 4>}]} {
    %c0 = arith.constant 0 : index
    %c0_0 = arith.constant 0 : index
    %0 = vector.load %arg1[%c0, %c0_0] : memref<128x16xf32, #tpu.memory_space<vmem>>, vector<128x16xf32>
    %1 = arith.truncf %0 : vector<128x16xf32> to vector<128x16xbf16>
    %c0_1 = arith.constant 0 : index
    %c0_2 = arith.constant 0 : index
    %2 = vector.load %arg2[%c0_1, %c0_2] : memref<16x128xbf16, #tpu.memory_space<vmem>>, vector<16x128xbf16>
    %cst = arith.constant dense<0.000000e+00> : vector<128x128xf32>
    %3 = tpu.matmul %1, %2, %cst {dimension_numbers = #tpu.dot_dimension_numbers<[1], [0], [0], [1], [0, 0, 1, 1], [], []>} : vector<128x16xbf16>, vector<16x128xbf16>, vector<128x128xf32> -> vector<128x128xf32>
    %c0_3 = arith.constant 0 : index
    %c0_4 = arith.constant 0 : index
    %4 = vector.load %arg3[%c0_3, %c0_4] : memref<1x128xf32, #tpu.memory_space<vmem>>, vector<1x128xf32>
    %5 = vector.broadcast %4 : vector<1x128xf32> to vector<128x128xf32>
    %6 = arith.addf %3, %5 : vector<128x128xf32>
    %7 = math.tanh %6 : vector<128x128xf32>
    %8 = arith.truncf %7 : vector<128x128xf32> to vector<128x128xbf16>
    %c0_5 = arith.constant 0 : index
    %c0_6 = arith.constant 0 : index
    %9 = vector.load %arg4[%c0_5, %c0_6] : memref<128x4xbf16, #tpu.memory_space<vmem>>, vector<128x4xbf16>
    %cst_7 = arith.constant dense<0.000000e+00> : vector<128x4xf32>
    %10 = tpu.matmul %8, %9, %cst_7 {dimension_numbers = #tpu.dot_dimension_numbers<[1], [0], [0], [1], [0, 0, 1, 1], [], []>} : vector<128x128xbf16>, vector<128x4xbf16>, vector<128x4xf32> -> vector<128x4xf32>
    %c0_8 = arith.constant 0 : index
    %c0_9 = arith.constant 0 : index
    %11 = vector.load %arg5[%c0_8, %c0_9] : memref<1x4xf32, #tpu.memory_space<vmem>>, vector<1x4xf32>
    %12 = vector.broadcast %11 : vector<1x4xf32> to vector<128x4xf32>
    %13 = arith.addf %10, %12 : vector<128x4xf32>
    %c0_10 = arith.constant 0 : index
    %c0_11 = arith.constant 0 : index
    %14 = vector.load %arg6[%c0_10, %c0_11] : memref<128x4xf32, #tpu.memory_space<vmem>>, vector<128x4xf32>
    tpu.vector_store %arg6[%c0_10, %c0_11], %13 {strides = array<i32>} : memref<128x4xf32, #tpu.memory_space<vmem>>, vector<128x4xf32>,
    return
  }
  func.func @transform_0(%arg0: i32) -> (i32, i32) {
    %c0_i32 = arith.constant 0 : i32
    %c0_i32_0 = arith.constant 0 : i32
    return %arg0, %c0_i32 : i32, i32
  }
  func.func @transform_1(%arg0: i32) -> (i32, i32) {
    %c0_i32 = arith.constant 0 : i32
    %c0_i32_0 = arith.constant 0 : i32
    %c0_i32_1 = arith.constant 0 : i32
    return %c0_i32, %c0_i32_0 : i32, i32
  }
  func.func @transform_2(%arg0: i32) -> (i32, i32) {
    %c0_i32 = arith.constant 0 : i32
    %c0_i32_0 = arith.constant 0 : i32
    %c0_i32_1 = arith.constant 0 : i32
    return %c0_i32, %c0_i32_0 : i32, i32
  }
  func.func @transform_3(%arg0: i32) -> (i32, i32) {
    %c0_i32 = arith.constant 0 : i32
    %c0_i32_0 = arith.constant 0 : i32
    %c0_i32_1 = arith.constant 0 : i32
    return %c0_i32, %c0_i32_0 : i32, i32
  }
  func.func @transform_4(%arg0: i32) -> (i32, i32) {
    %c0_i32 = arith.constant 0 : i32
    %c0_i32_0 = arith.constant 0 : i32
    %c0_i32_1 = arith.constant 0 : i32
    return %c0_i32, %c0_i32_0 : i32, i32
  }
  func.func @transform_5(%arg0: i32) -> (i32, i32) {
    %c0_i32 = arith.constant 0 : i32
    %c0_i32_0 = arith.constant 0 : i32
    return %arg0, %c0_i32 : i32, i32
  }
}

</mosaic_0001>

<bundles_post_ra>
// kernel: mlp_policy_forward.1
= control target key start
LH: loop header
LB: loop body
LE: loop exit
PB: predicated region body
PF: predicated region fallthrough
CT: control target
= control target key end

     0   :  { %s863_s18 = smov 0   ;;  %s980_s0 = inlined_call_operand.vmem [shape: f32[256,16], index: 0, kind: input, shape index: {}]   ;;  %s981_s1 = inlined_call_operand.vmem [shape: bf16[16,128], index: 1, kind: input, shape index: {}]   ;;  %s982_s2 = inlined_call_operand.vmem [shape: f32[1,128], index: 2, kind: input, shape index: {}]   ;;  %s983_s3 = inlined_call_operand.vmem [shape: bf16[128,4], index: 3, kind: input, shape index: {}]   ;;  %s984_s4 = inlined_call_operand.vmem [shape: f32[1,4], index: 4, kind: input, shape index: {}]   ;;  %s985_s5 = inlined_call_operand.vmem [shape: f32[256,4], index: 5, kind: output, shape index: {}]  }
   0x1 LB: > { %s655_s19 = sadd.s32 4294967295, %s831_s18   ;;  %p659_p0 = scmp.ge.s32.totalorder %s831_s18, 1  ;;  %s831_s18 = sphi %s863_s18, %s15_s18  }
   0x2   : > { %p188_p1 = scmp.lt.s32.totalorder %s831_s18, 3 }
   0x4   : > { %p189_p2 = pnand %p659_p0, %p188_p1 }
   0x5   : > { %v784_v0 = vld [vmem:[%s981_s1] sm:$0xff] (!%p189_p2)   ;;  %s660_s22 = sshll.u32 (!%p189_p2), %s655_s19, 4  ;;  %v786_v2 = vld [vmem:[%s983_s3 + $0x8] sm:$0xff] (!%p189_p2)   ;;  %v787_v3 = vld [vmem:[%s983_s3 + $0x10] sm:$0xff] (!%p189_p2)   ;;  %vm268_vm0 = vcmask (!%p189_p2), 130048   ;;  %vm582_vm1 = vcmask (!%p189_p2), 31744  }
   0x6   : > { %192 = sbr.rel (%p189_p2) target bundleno = 493 (0x1ed), region = 40  ;;  %p217_p3 = scmp.lt.s32.totalorder (!%p189_p2), %s660_s22, 31  ;;  %710 = vmatprep.subr.bf16.mxu0 (!%p189_p2), %v784_v0  ;;  %v785_v1 = vld [vmem:[%s983_s3] sm:$0xff] (!%p189_p2)   ;;  %v788_v28 = vld [vmem:[%s983_s3 + $0x18] sm:$0xff] (!%p189_p2)   ;;  %v790_v30 = vld [vmem:[%s983_s3 + $0x28] sm:$0xff] (!%p189_p2)  }
   0x7   : > { %711 = vmatpush3.bf16.msra.mxu0 (!%p189_p2), %v784_v0  ;;  %760 = vmatprep.subr.bf16.mxu1 (!%p189_p2), %v785_v1  ;;  %v789_v29 = vld [vmem:[%s983_s3 + $0x20] sm:$0xff] (!%p189_p2)   ;;  %v791_v31 = vld [vmem:[%s983_s3 + $0x30] sm:$0xff] (!%p189_p2)   ;;  %v792_v32 = vld [vmem:[%s983_s3 + $0x38] sm:$0xff] (!%p189_p2)  }
   0x8   : > { %728 = vmatprep.subr.bf16.mxu0 (!%p189_p2), %v785_v1  ;;  %768 = vmatpush3.bf16.msra.mxu1 (!%p189_p2), %v785_v1  ;;  %v664_v33 = vld [vmem:[%s982_s2] ss:$0 sm:$0xff] (!%p189_p2) }
   0x9   : > { %761 = vmatprep.subr.bf16.mxu1 (!%p189_p2), %v786_v2 }
   0xc   : > { %769 = vmatpush3.bf16.msra.mxu1 (!%p189_p2), %v786_v2 }
   0xd   : > { %s987_s22 = smov (!%p217_p3, %s660_s22), 31  ;;  %762 = vmatprep.subr.bf16.mxu1 %v787_v3 }
   0xe   : > { %s661_s27 = sshll.u32 %s987_s22, 3 }
   0xf   : > { %s888_s30 = scalar_lea.vmem %s980_s0, %s661_s27  ;;  %s943_s26 = scalar_lea.vmem %s985_s5, %s661_s27 }
  0x10   : > { %v229_v4 = vld [vmem:[%s888_s30] sm:$0xff]  ;;  %v230_v5 = vld [vmem:[%s888_s30 + $0x8] sm:$0xff]  ;;  %v231_v6 = vld [vmem:[%s888_s30 + $0x10] sm:$0xff]  ;;  %770 = vmatpush3.bf16.msra.mxu1 %v787_v3 }
  0x11   : > { %v245_v7 = vpack.c.bf16 %v230_v5, %v229_v4  ;;  %v232_v8 = vld [vmem:[%s888_s30 + $0x18] sm:$0xff]  ;;  %v233_v9 = vld [vmem:[%s888_s30 + $0x20] sm:$0xff]  ;;  %v234_v10 = vld [vmem:[%s888_s30 + $0x28] sm:$0xff]  ;;  %763 = vmatprep.subr.bf16.mxu1 %v788_v28 }
  0x12   : > { %v246_v11 = vpack.c.bf16 %v232_v8, %v231_v6  ;;  %v247_v12 = vpack.c.bf16 %v234_v10, %v233_v9  ;;  %v235_v13 = vld [vmem:[%s888_s30 + $0x30] sm:$0xff]  ;;  %v236_v14 = vld [vmem:[%s888_s30 + $0x38] sm:$0xff]  ;;  %v237_v15 = vld [vmem:[%s888_s30 + $0x40] sm:$0xff] }
  0x13   : > { %712 = vmatprep.mubr.msk.bf16.mxu0 %vm268_vm0, %v245_v7  ;;  %v238_v16 = vld [vmem:[%s888_s30 + $0x48] sm:$0xff]  ;;  %v248_v17 = vpack.c.bf16 %v236_v14, %v235_v13  ;;  %v239_v19 = vld [vmem:[%s888_s30 + $0x50] sm:$0xff]  ;;  %v240_v20 = vld [vmem:[%s888_s30 + $0x58] sm:$0xff] }
  0x14   : > { %713 = vmatmul.mubr.msk.bf16.vlgmr.msra.gmra.mrb[0].mxu0 %vm268_vm0, %v246_v11  ;;  %v249_v18 = vpack.c.bf16 %v238_v16, %v237_v15  ;;  %v241_v21 = vld [vmem:[%s888_s30 + $0x60] sm:$0xff]  ;;  %v242_v22 = vld [vmem:[%s888_s30 + $0x68] sm:$0xff]  ;;  %v250_v23 = vpack.c.bf16 %v240_v20, %v239_v19  ;;  %v243_v25 = vld [vmem:[%s888_s30 + $0x70] sm:$0xff]  ;;  %771 = vmatpush3.bf16.msra.mxu1 %v788_v28 }
  0x15   : > { %716 = vmatprep.mubr.msk.bf16.mxu0 %vm268_vm0, %v247_v12  ;;  %729 = vmatpush3.bf16.msra.mxu0 %v785_v1  ;;  %v251_v24 = vpack.c.bf16 %v242_v22, %v241_v21  ;;  %v244_v26 = vld [vmem:[%s888_s30 + $0x78] sm:$0xff] }
  0x16   : > { %730 = vmatprep.subr.bf16.mxu0 %v786_v2  ;;  %v252_v27 = vpack.c.bf16 %v244_v26, %v243_v25  ;;  %764 = vmatprep.subr.bf16.mxu1 %v789_v29  ;;  %v674_v26 = vld [vmem:[%s984_s4] ss:$0 sm:$0xff] }
  0x18   : > { %772 = vmatpush3.bf16.msra.mxu1 %v789_v29 }
  0x19   : > { %731 = vmatpush3.bf16.msra.mxu0 %v786_v2  ;;  %765 = vmatprep.subr.bf16.mxu1 %v790_v30 }
  0x1a   : > { %732 = vmatprep.subr.bf16.mxu0 %v787_v3 }
  0x1c   : > { %717 = vmatmul.mubr.msk.bf16.gmra.mrb[4].mxu0 %vm268_vm0, %v248_v17  ;;  %773 = vmatpush3.bf16.msra.mxu1 %v790_v30 }
  0x1d   : > { %720 = vmatprep.mubr.msk.bf16.mxu0 %vm268_vm0, %v249_v18  ;;  %733 = vmatpush3.bf16.msra.mxu0 %v787_v3 }
  0x1e   : > { %734 = vmatprep.subr.bf16.mxu0 %v788_v28  ;;  %766 = vmatprep.subr.bf16.mxu1 %v791_v31 }
  0x20   : > { %774 = vmatpush3.bf16.msra.mxu1 %v791_v31 }
  0x21   : > { %735 = vmatpush3.bf16.msra.mxu0 %v788_v28  ;;  %767 = vmatprep.subr.bf16.mxu1 %v792_v32 }
  0x22   : > { %736 = vmatprep.subr.bf16.mxu0 %v789_v29 }
  0x24   : > { %721 = vmatmul.mubr.msk.bf16.gmra.mrb[8].mxu0 %vm268_vm0, %v250_v23  ;;  %775 = vmatpush3.bf16.msra.mxu1 %v792_v32 }
  0x25   : > { %724 = vmatprep.mubr.msk.bf16.mxu0 %vm268_vm0, %v251_v24  ;;  %737 = vmatpush3.bf16.msra.mxu0 %v789_v29 }
  0x26   : > { %738 = vmatprep.subr.bf16.mxu0 %v790_v30 }
  0x29   : > { %739 = vmatpush3.bf16.msra.mxu0 %v790_v30 }
  0x2a   : > { %740 = vmatprep.subr.bf16.mxu0 %v791_v31 }
  0x2c   : > { %725 = vmatmul.mubr.msk.bf16.gmra.mrb[12].mxu0 %vm268_vm0, %v252_v27 }
  0x2d   : > { %741 = vmatpush3.bf16.msra.mxu0 %v791_v31 }
  0x2e   : > { %742 = vmatprep.subr.bf16.mxu0 %v792_v32 }
  0x31   : > { %743 = vmatpush3.bf16.msra.mxu0 %v792_v32 }
  0xe7   : > { %v714_v34 = vpop.f32.mrb[0].mxu0 }
  0xe8   : > { %v336_v35 = vadd.f32 %v714_v34, %v664_v33  ;;  %v327_v36 = vpop.f32.mrb[1].mxu0 }
  0xe9   : > { %v328_v37 = vadd.f32 %v664_v33, %v327_v36  ;;  %v715_v38 = vpop.f32.mrb[2].mxu0 }
  0xea   : > { %793 = vtanh.f32 %v336_v35  ;;  %v339_v39 = vadd.f32 %v715_v38, %v664_v33  ;;  %v330_v40 = vpop.f32.mrb[3].mxu0 }
  0xeb   : > { %795 = vtanh.f32 %v328_v37  ;;  %v331_v41 = vadd.f32 %v664_v33, %v330_v40 }
  0xec   : > { %797 = vtanh.f32 %v339_v39 }
  0xed   : > { %799 = vtanh.f32 %v331_v41 }
  0xef   : > { %v718_v42 = vpop.f32.mrb[4].mxu0 }
  0xf0   : > { %v352_v43 = vadd.f32 %v718_v42, %v664_v33  ;;  %v343_v44 = vpop.f32.mrb[5].mxu0 }
  0xf1   : > { %v344_v45 = vadd.f32 %v664_v33, %v343_v44  ;;  %v719_v46 = vpop.f32.mrb[6].mxu0 }
  0xf2   : > { %801 = vtanh.f32 %v352_v43  ;;  %v355_v47 = vadd.f32 %v719_v46, %v664_v33  ;;  %v346_v48 = vpop.f32.mrb[7].mxu0 }
  0xf3   : > { %803 = vtanh.f32 %v344_v45  ;;  %v347_v49 = vadd.f32 %v664_v33, %v346_v48 }
  0xf4   : > { %v794_v50 = vpop.eup %793  ;;  %805 = vtanh.f32 %v355_v47 }
  0xf5   : > { %v796_v51 = vpop.eup %795  ;;  %807 = vtanh.f32 %v347_v49 }
  0xf6   : > { %v798_v52 = vpop.eup %797 }
  0xf7   : > { %v800_v53 = vpop.eup %799  ;;  %v722_v54 = vpop.f32.mrb[8].mxu0  ;;  %v407_v55 = vpack.c.bf16 %v798_v52, %v794_v50 }
  0xf8   : > { %v368_v56 = vadd.f32 %v722_v54, %v664_v33  ;;  %v359_v57 = vpop.f32.mrb[9].mxu0  ;;  %v406_v58 = vpack.c.bf16 %v800_v53, %v796_v51 }
  0xf9   : > { %v360_v59 = vadd.f32 %v664_v33, %v359_v57  ;;  %v723_v60 = vpop.f32.mrb[10].mxu0 }
  0xfa   : > { %809 = vtanh.f32 %v368_v56  ;;  %v371_v61 = vadd.f32 %v723_v60, %v664_v33  ;;  %v362_v62 = vpop.f32.mrb[11].mxu0  ;;  %744 = vmatprep.mubr.bf16.mxu0 %v406_v58 }
  0xfb   : > { %811 = vtanh.f32 %v360_v59  ;;  %v363_v63 = vadd.f32 %v664_v33, %v362_v62  ;;  %745 = vmatmul.mubr.bf16.vlgmr.msra.gmra.mrb[16].mxu0 %v407_v55 }
  0xfc   : > { %v802_v0 = vpop.eup %801  ;;  %813 = vtanh.f32 %v371_v61 }
  0xfd   : > { %v804_v1 = vpop.eup %803  ;;  %815 = vtanh.f32 %v363_v63 }
  0xfe   : > { %v806_v2 = vpop.eup %805 }
  0xff   : > { %v808_v3 = vpop.eup %807  ;;  %v726_v4 = vpop.f32.mrb[12].mxu0  ;;  %v409_v5 = vpack.c.bf16 %v806_v2, %v802_v0 }
 0x100   : > { %v384_v6 = vadd.f32 %v726_v4, %v664_v33  ;;  %v375_v7 = vpop.f32.mrb[13].mxu0  ;;  %v408_v8 = vpack.c.bf16 %v808_v3, %v804_v1 }
 0x101   : > { %v376_v9 = vadd.f32 %v664_v33, %v375_v7  ;;  %v727_v10 = vpop.f32.mrb[14].mxu0 }
 0x102   : > { %817 = vtanh.f32 %v384_v6  ;;  %v387_v11 = vadd.f32 %v727_v10, %v664_v33  ;;  %v378_v12 = vpop.f32.mrb[15].mxu0  ;;  %748 = vmatprep.mubr.bf16.mxu1 %v408_v8 }
 0x103   : > { %819 = vtanh.f32 %v376_v9  ;;  %v379_v13 = vadd.f32 %v664_v33, %v378_v12  ;;  %749 = vmatmul.mubr.bf16.vlgmr.msra.gmra.mrb[0].mxu1 %v409_v5 }
 0x104   : > { %v810_v14 = vpop.eup %809  ;;  %821 = vtanh.f32 %v387_v11 }
 0x105   : > { %v812_v15 = vpop.eup %811  ;;  %823 = vtanh.f32 %v379_v13 }
 0x106   : > { %v814_v16 = vpop.eup %813 }
 0x107   : > { %v816_v17 = vpop.eup %815  ;;  %v411_v18 = vpack.c.bf16 %v814_v16, %v810_v14 }
 0x108   : > { %v410_v19 = vpack.c.bf16 %v816_v17, %v812_v15 }
 0x10a   : > { %752 = vmatprep.mubr.bf16.mxu1 %v410_v19 }
 0x10b   : > { %753 = vmatmul.mubr.bf16.gmra.mrb[4].mxu1 %v411_v18 }
 0x10c   : > { %v818_v20 = vpop.eup %817 }
 0x10d   : > { %v820_v21 = vpop.eup %819 }
 0x10e   : > { %v822_v22 = vpop.eup %821 }
 0x10f   : > { %v824_v23 = vpop.eup %823  ;;  %v413_v24 = vpack.c.bf16 %v822_v22, %v818_v20 }
 0x110   : > { %v412_v25 = vpack.c.bf16 %v824_v23, %v820_v21 }
 0x112   : > { %756 = vmatprep.mubr.bf16.mxu1 %v412_v25 }
 0x113   : > { %757 = vmatmul.mubr.bf16.gmra.mrb[8].mxu1 %v413_v24 }
 0x1ce   : > { %v746_v27 = vpop.f32.mrb[16].mxu0 }
 0x1cf   : > { %v528_v28 = vadd.f32 %v746_v27, %v674_v26  ;;  %v519_v29 = vpop.f32.mrb[17].mxu0 }
 0x1d0   : > { %v520_v30 = vadd.f32 %v674_v26, %v519_v29  ;;  %v747_v31 = vpop.f32.mrb[18].mxu0 }
 0x1d1   : > { %585 = vst.msk [vmem:[%s943_s26 + $0x10] sm:$0xff] %vm582_vm1, %v528_v28  ;;  %v531_v32 = vadd.f32 %v747_v31, %v674_v26  ;;  %v522_v33 = vpop.f32.mrb[19].mxu0 }
 0x1d2   : > { %583 = vst.msk [vmem:[%s943_s26] sm:$0xff] %vm582_vm1, %v520_v30  ;;  %v523_v34 = vadd.f32 %v674_v26, %v522_v33 }
 0x1d3   : > { %586 = vst.msk [vmem:[%s943_s26 + $0x18] sm:$0xff] %vm582_vm1, %v531_v32 }
 0x1d4   : > { %584 = vst.msk [vmem:[%s943_s26 + $0x8] sm:$0xff] %vm582_vm1, %v523_v34 }
 0x1d6   : > { %v750_v35 = vpop.f32.mrb[0].mxu1 }
 0x1d7   : > { %v544_v36 = vadd.f32 %v750_v35, %v674_v26  ;;  %v535_v37 = vpop.f32.mrb[1].mxu1 }
 0x1d8   : > { %v536_v38 = vadd.f32 %v674_v26, %v535_v37  ;;  %v751_v39 = vpop.f32.mrb[2].mxu1 }
 0x1d9   : > { %589 = vst.msk [vmem:[%s943_s26 + $0x30] sm:$0xff] %vm582_vm1, %v544_v36  ;;  %v547_v40 = vadd.f32 %v751_v39, %v674_v26  ;;  %v538_v41 = vpop.f32.mrb[3].mxu1 }
 0x1da   : > { %587 = vst.msk [vmem:[%s943_s26 + $0x20] sm:$0xff] %vm582_vm1, %v536_v38  ;;  %v539_v42 = vadd.f32 %v674_v26, %v538_v41 }
 0x1db   : > { %590 = vst.msk [vmem:[%s943_s26 + $0x38] sm:$0xff] %vm582_vm1, %v547_v40 }
 0x1dc   : > { %588 = vst.msk [vmem:[%s943_s26 + $0x28] sm:$0xff] %vm582_vm1, %v539_v42 }
 0x1de   : > { %v754_v43 = vpop.f32.mrb[4].mxu1 }
 0x1df   : > { %v560_v44 = vadd.f32 %v754_v43, %v674_v26  ;;  %v551_v45 = vpop.f32.mrb[5].mxu1 }
 0x1e0   : > { %v552_v46 = vadd.f32 %v674_v26, %v551_v45  ;;  %v755_v47 = vpop.f32.mrb[6].mxu1 }
 0x1e1   : > { %593 = vst.msk [vmem:[%s943_s26 + $0x50] sm:$0xff] %vm582_vm1, %v560_v44  ;;  %v563_v48 = vadd.f32 %v755_v47, %v674_v26  ;;  %v554_v49 = vpop.f32.mrb[7].mxu1 }
 0x1e2   : > { %591 = vst.msk [vmem:[%s943_s26 + $0x40] sm:$0xff] %vm582_vm1, %v552_v46  ;;  %v555_v50 = vadd.f32 %v674_v26, %v554_v49 }
 0x1e3   : > { %594 = vst.msk [vmem:[%s943_s26 + $0x58] sm:$0xff] %vm582_vm1, %v563_v48 }
 0x1e4   : > { %592 = vst.msk [vmem:[%s943_s26 + $0x48] sm:$0xff] %vm582_vm1, %v555_v50 }
 0x1e6   : > { %v758_v51 = vpop.f32.mrb[8].mxu1 }
 0x1e7   : > { %v576_v52 = vadd.f32 %v758_v51, %v674_v26  ;;  %v567_v53 = vpop.f32.mrb[9].mxu1 }
 0x1e8   : > { %v568_v54 = vadd.f32 %v674_v26, %v567_v53  ;;  %v759_v55 = vpop.f32.mrb[10].mxu1 }
 0x1e9   : > { %597 = vst.msk [vmem:[%s943_s26 + $0x70] sm:$0xff] %vm582_vm1, %v576_v52  ;;  %v579_v56 = vadd.f32 %v759_v55, %v674_v26  ;;  %v570_v57 = vpop.f32.mrb[11].mxu1 }
 0x1ea   : > { %595 = vst.msk [vmem:[%s943_s26 + $0x60] sm:$0xff] %vm582_vm1, %v568_v54  ;;  %v571_v58 = vadd.f32 %v674_v26, %v570_v57 }
 0x1eb   : > { %598 = vst.msk [vmem:[%s943_s26 + $0x78] sm:$0xff] %vm582_vm1, %v579_v56 }
 0x1ec   : > { %596 = vst.msk [vmem:[%s943_s26 + $0x68] sm:$0xff] %vm582_vm1, %v571_v58 }
 0x1ed PF: > { %s15_s18 = sadd.s32 1, %s831_s18  }
 0x1ee   : > { %p12_p4 = scmp.ge.s32.totalorder %s15_s18, 4  }
 0x1f0   :  { %14 = sbr.rel (!%p12_p4) target bundleno = 1 (0x1), region = 70 }

</bundles_post_ra>
